<compile_context>
chip_gen: v5e
topology: v5e:2x2
jax: 0.10.0
libtpu: 0.0.40
codegen_flags: <defaults>
</compile_context>

<pallas_src>
import functools

import jax
import jax.numpy as jnp
from jax.experimental import pallas as pl
from jax.experimental.pallas import tpu as pltpu


def _conv_prelu_kernel(x_ref, w_ref, ba_ref, o_ref, *, img_w):
    """One grid step = one (batch, row-band) tile: fused 3x3 conv + bias + PReLU.

    x_ref : (3C, MT)      three ky-shifted input planes, spatial (rows*W) on lanes
    w_ref : (3, Cout, 3C) conv weights grouped by kx (columns ordered ky*C + c)
    ba_ref: (Cout, 2)     [:, 0] = bias, [:, 1] = PReLU slope (repeated r^2 per channel)
    o_ref : (Cout, MT)    conv+bias+PReLU output (pre-PixelShuffle), spatial on lanes
    """
    x = x_ref[...]
    mt = x.shape[-1]

    # Column index within an image row.  MT is a whole number of rows, so the block-local
    # lane index is congruent to the global spatial index mod W.
    col = jax.lax.broadcasted_iota(jnp.int32, (1, mt), 1) % img_w

    # kx = 0 tap needs x[.., w-1]; kx = 2 tap needs x[.., w+1].  The lane rolls wrap across
    # row (and tile) boundaries, but those lanes are exactly the ones that must read the
    # convolution's zero padding, so they are masked to zero.
    x_m1 = jnp.where(col == 0, jnp.zeros_like(x), pltpu.roll(x, shift=1, axis=1))
    x_p1 = jnp.where(col == img_w - 1, jnp.zeros_like(x), pltpu.roll(x, shift=mt - 1, axis=1))

    y = jnp.dot(w_ref[0], x_m1, preferred_element_type=jnp.float32)
    y = y + jnp.dot(w_ref[1], x, preferred_element_type=jnp.float32)
    y = y + jnp.dot(w_ref[2], x_p1, preferred_element_type=jnp.float32)

    y = y + ba_ref[:, 0:1]                               # bias
    y = jnp.where(y >= 0.0, y, y * ba_ref[:, 1:2])       # fused per-channel PReLU
    o_ref[...] = y.astype(o_ref.dtype)


def _pick_rows(H, W, C, r, n_batch, budget_bytes):
    """Pick the tallest row-band (rows | H) whose tile fits the VMEM budget.

    Prefers 128-lane-aligned tiles (rows*W % 128 == 0) and a grid with >= 2 total steps so
    both v7x TensorCores get work.  If no divisor of H gives a 128-aligned tile we fall back
    to the full image per tile ('block == full dim' exception covers the lane constraint).
    """
    Cout = C * r * r
    C3 = 3 * C

    def tile_bytes(rows):
        mt = rows * W
        # double-buffered input + output tiles, one weight copy, one bias/alpha copy
        return 4 * (2 * C3 * mt + 2 * Cout * mt + 3 * Cout * C3 + 2 * Cout)

    divisors = [d for d in range(1, H + 1) if H % d == 0]
    aligned = [d for d in divisors if (d * W) % 128 == 0]
    if aligned:
        pool = [d for d in aligned if tile_bytes(d) <= budget_bytes] or [min(aligned)]
    else:
        pool = [H]
    rows = max(pool)
    if n_batch * (H // rows) < 2:            # keep both v7x TensorCores busy if possible
        multi = [d for d in pool if H // d >= 2]
        if multi:
            rows = max(multi)
    return rows


def upsample_forward(x_nchw, weight, bias, alpha, scale_factor=4,
                     vmem_tile_budget_bytes=28 * 1024 * 1024,
                     use_bf16_matmul=False):
    """Forward pass of the PyTorch `Upsample` module.

    x_nchw : (N, C, H, W) float32
    weight : (C*r^2, C, 3, 3) float32   (torch Conv2d OIHW layout)
    bias   : (C*r^2,) float32
    alpha  : (C,) float32               (PReLU per-channel slope)
    returns: (N, C, H*r, W*r) float32
    """
    r = scale_factor
    N, C, H, W = x_nchw.shape
    Cout = C * r * r
    C3 = 3 * C
    HW = H * W

    rows = _pick_rows(H, W, C, r, N, vmem_tile_budget_bytes)
    MT = rows * W
    n_tiles = H // rows

    # ---- glue: only the 3 ky-shifted planes are materialized (3x input, not 9x) ----
    xp = jnp.pad(x_nchw, ((0, 0), (0, 0), (1, 1), (0, 0)))                    # pad H only
    x3 = jnp.concatenate([xp[:, :, ky:ky + H, :] for ky in range(3)], axis=1)  # (N, 3C, H, W)
    x3 = x3.reshape(N, C3, HW)                                                 # row = ky*C + c

    # torch OIHW -> (kx, Cout, 3C) with column index ky*C + c (matches x3 row order).
    wk = jnp.transpose(weight, (3, 0, 2, 1)).reshape(3, Cout, C3)
    # PixelShuffle maps conv channel co -> image channel co // r^2, so the per-channel PReLU
    # slope can be applied before the shuffle by repeating it r^2 times.  Fuse with bias.
    ba = jnp.stack([bias, jnp.repeat(alpha, r * r)], axis=1)                   # (Cout, 2)

    if use_bf16_matmul:   # v6e/v7x MXU rate + halved input DMA bytes (looser tolerance)
        x3 = x3.astype(jnp.bfloat16)
        wk = wk.astype(jnp.bfloat16)

    kernel = functools.partial(_conv_prelu_kernel, img_w=W)

    out_t = pl.pallas_call(
        kernel,
        out_shape=jax.ShapeDtypeStruct((N, Cout, HW), x_nchw.dtype),
        grid_spec=pltpu.PrefetchScalarGridSpec(
            num_scalar_prefetch=0,
            grid=(N, n_tiles),
            in_specs=[
                pl.BlockSpec((None, C3, MT), lambda n, m: (n, 0, m)),
                pl.BlockSpec((3, Cout, C3), lambda n, m: (0, 0, 0)),   # constant -> fetched once
                pl.BlockSpec((Cout, 2), lambda n, m: (0, 0)),          # constant -> fetched once
            ],
            out_specs=pl.BlockSpec((None, Cout, MT), lambda n, m: (n, 0, m)),
        ),
        compiler_params=pltpu.CompilerParams(
            dimension_semantics=("parallel", "parallel"),
            # <= ~48 MiB keeps v7x's 64 MiB core safe; v5e/v6e (128 MiB) could go higher
            # together with a larger vmem_tile_budget_bytes for very large images.
            vmem_limit_bytes=48 * 1024 * 1024,
        ),
    )(x3, wk, ba)

    # ---- glue: PixelShuffle (pure permutation) back to NCHW ----
    # TODO(synk): fold this pass into the kernel (see header note) to drop a full
    #             read+write of the r^2-sized output.
    out_t = out_t.reshape(N, C, r, r, H, W)              # co = c*r^2 + r1*r + r2
    y = jnp.transpose(out_t, (0, 1, 4, 2, 5, 3))         # (N, C, H, r1, W, r2)
    return y.reshape(N, C, H * r, W * r)


def _reference_forward(x, weight, bias, alpha, r):
    """Pure-JAX (XLA) reference matching the PyTorch module exactly."""
    y = jax.lax.conv_general_dilated(
        x, weight, window_strides=(1, 1), padding=((1, 1), (1, 1)),
        dimension_numbers=("NCHW", "OIHW", "NCHW"))
    y = y + bias.reshape(1, -1, 1, 1)
    N, Co, H, W = y.shape
    C = Co // (r * r)
    y = y.reshape(N, C, r, r, H, W).transpose(0, 1, 4, 2, 5, 3).reshape(N, C, H * r, W * r)
    return jnp.where(y >= 0, y, y * alpha.reshape(1, -1, 1, 1))


if __name__ == "__main__":
    N, C, H, W = 2, 4, 16, 16
    scale = 4
    Cout = C * scale * scale

    key = jax.random.PRNGKey(0)
    k_x, k_w, k_b = jax.random.split(key, 3)

    x = jax.random.normal(k_x, (N, C, H, W), dtype=jnp.float32)
    weight = 0.1 * jax.random.normal(k_w, (Cout, C, 3, 3), dtype=jnp.float32)
    bias = 0.05 * jax.random.normal(k_b, (Cout,), dtype=jnp.float32)
    alpha = jnp.linspace(0.1, 0.4, C, dtype=jnp.float32)   # PReLU per-channel slopes

    fwd = jax.jit(functools.partial(upsample_forward, scale_factor=scale))
    out = jax.block_until_ready(fwd(x, weight, bias, alpha))

    ref = _reference_forward(x, weight, bias, alpha, scale)
    assert out.shape == (N, C, H * scale, W * scale), out.shape
    assert jnp.allclose(out, ref, atol=1e-4, rtol=1e-4), float(jnp.max(jnp.abs(out - ref)))

    print("KERNEL_OK")
</pallas_src>

<mosaic_0001>
module attributes {stable_mosaic.version = 11 : i64} {
  func.func @_conv_prelu_kernel(%arg0: i32, %arg1: i32, %arg2: memref<1x12x256xf32, #tpu.memory_space<vmem>>, %arg3: memref<3x64x12xf32, #tpu.memory_space<vmem>>, %arg4: memref<64x2xf32, #tpu.memory_space<vmem>>, %arg5: memref<1x64x256xf32, #tpu.memory_space<vmem>>) attributes {dimension_semantics = [#tpu.dimension_semantics<parallel>, #tpu.dimension_semantics<parallel>], iteration_bounds = array<i64: 2, 1>, scalar_prefetch = 0 : i64, scratch_operands = 0 : i64, tpu.core_type = #tpu.core_type<tc>, window_params = [{transform_indices = @transform_0, window_bounds = array<i64: 1, 12, 256>}, {pipeline_mode = #tpu.pipeline_mode<synchronous>, transform_indices = @transform_1, window_bounds = array<i64: 3, 64, 12>}, {pipeline_mode = #tpu.pipeline_mode<synchronous>, transform_indices = @transform_2, window_bounds = array<i64: 64, 2>}, {transform_indices = @transform_3, window_bounds = array<i64: 1, 64, 256>}]} {
    %c0 = arith.constant 0 : index
    %c0_0 = arith.constant 0 : index
    %c0_1 = arith.constant 0 : index
    %0 = vector.load %arg2[%c0, %c0_0, %c0_1] : memref<1x12x256xf32, #tpu.memory_space<vmem>>, vector<1x12x256xf32>
    %1 = vector.shape_cast %0 : vector<1x12x256xf32> to vector<12x256xf32>
    %2 = tpu.iota {dimensions = array<i32: 1>} : vector<1x256xi32>
    %c16_i32 = arith.constant 16 : i32
    %c0_i32 = arith.constant 0 : i32
    %3 = arith.cmpi eq, %c16_i32, %c0_i32 : i32
    %c1_i32 = arith.constant 1 : i32
    %4 = arith.select %3, %c1_i32, %c16_i32 : i32
    %5 = vector.broadcast %4 : i32 to vector<1x256xi32>
    %6 = arith.remsi %2, %5 : vector<1x256xi32>
    %c0_i32_2 = arith.constant 0 : i32
    %7 = vector.broadcast %c0_i32_2 : i32 to vector<1x256xi32>
    %8 = arith.cmpi ne, %6, %7 : vector<1x256xi32>
    %c0_i32_3 = arith.constant 0 : i32
    %9 = vector.broadcast %c0_i32_3 : i32 to vector<1x256xi32>
    %10 = arith.cmpi slt, %6, %9 : vector<1x256xi32>
    %c0_i32_4 = arith.constant 0 : i32
    %11 = arith.cmpi slt, %4, %c0_i32_4 : i32
    %12 = vector.broadcast %11 : i1 to vector<1x256xi1>
    %13 = vector.broadcast %12 : vector<1x256xi1> to vector<1x256xi1>
    %14 = arith.xori %10, %13 : vector<1x256xi1>
    %15 = arith.andi %14, %8 : vector<1x256xi1>
    %16 = vector.broadcast %4 : i32 to vector<1x256xi32>
    %17 = arith.addi %6, %16 : vector<1x256xi32>
    %18 = arith.select %15, %17, %6 : vector<1x256xi1>, vector<1x256xi32>
    %c0_i32_5 = arith.constant 0 : i32
    %19 = vector.broadcast %c0_i32_5 : i32 to vector<1x256xi32>
    %20 = arith.cmpi eq, %18, %19 : vector<1x256xi32>
    %cst = arith.constant 0.000000e+00 : f32
    %21 = vector.broadcast %cst : f32 to vector<12x256xf32>
    %c1_i32_6 = arith.constant 1 : i32
    %22 = tpu.dynamic_rotate %1 by %c1_i32_6 dim 1 : vector<12x256xf32>, i32 -> vector<12x256xf32>
    %23 = vector.shape_cast %20 : vector<1x256xi1> to vector<1x256xi1>
    %24 = vector.broadcast %23 : vector<1x256xi1> to vector<12x256xi1>
    %25 = arith.select %24, %21, %22 : vector<12x256xi1>, vector<12x256xf32>
    %c15_i32 = arith.constant 15 : i32
    %26 = vector.broadcast %c15_i32 : i32 to vector<1x256xi32>
    %27 = arith.cmpi eq, %18, %26 : vector<1x256xi32>
    %cst_7 = arith.constant 0.000000e+00 : f32
    %28 = vector.broadcast %cst_7 : f32 to vector<12x256xf32>
    %c255_i32 = arith.constant 255 : i32
    %29 = tpu.dynamic_rotate %1 by %c255_i32 dim 1 : vector<12x256xf32>, i32 -> vector<12x256xf32>
    %30 = vector.shape_cast %27 : vector<1x256xi1> to vector<1x256xi1>
    %31 = vector.broadcast %30 : vector<1x256xi1> to vector<12x256xi1>
    %32 = arith.select %31, %28, %29 : vector<12x256xi1>, vector<12x256xf32>
    %c0_8 = arith.constant 0 : index
    %c0_9 = arith.constant 0 : index
    %c0_10 = arith.constant 0 : index
    %33 = vector.load %arg3[%c0_8, %c0_9, %c0_10] : memref<3x64x12xf32, #tpu.memory_space<vmem>>, vector<1x64x12xf32>
    %34 = vector.shape_cast %33 : vector<1x64x12xf32> to vector<64x12xf32>
    %cst_11 = arith.constant dense<0.000000e+00> : vector<64x256xf32>
    %35 = tpu.matmul %34, %25, %cst_11 {dimension_numbers = #tpu.dot_dimension_numbers<[1], [0], [0], [1], [0, 0, 1, 1], [], []>} : vector<64x12xf32>, vector<12x256xf32>, vector<64x256xf32> -> vector<64x256xf32>
    %c1 = arith.constant 1 : index
    %c0_12 = arith.constant 0 : index
    %c0_13 = arith.constant 0 : index
    %36 = vector.load %arg3[%c1, %c0_12, %c0_13] : memref<3x64x12xf32, #tpu.memory_space<vmem>>, vector<1x64x12xf32>
    %37 = vector.shape_cast %36 : vector<1x64x12xf32> to vector<64x12xf32>
    %cst_14 = arith.constant dense<0.000000e+00> : vector<64x256xf32>
    %38 = tpu.matmul %37, %1, %cst_14 {dimension_numbers = #tpu.dot_dimension_numbers<[1], [0], [0], [1], [0, 0, 1, 1], [], []>} : vector<64x12xf32>, vector<12x256xf32>, vector<64x256xf32> -> vector<64x256xf32>
    %39 = arith.addf %35, %38 : vector<64x256xf32>
    %c2 = arith.constant 2 : index
    %c0_15 = arith.constant 0 : index
    %c0_16 = arith.constant 0 : index
    %40 = vector.load %arg3[%c2, %c0_15, %c0_16] : memref<3x64x12xf32, #tpu.memory_space<vmem>>, vector<1x64x12xf32>
    %41 = vector.shape_cast %40 : vector<1x64x12xf32> to vector<64x12xf32>
    %cst_17 = arith.constant dense<0.000000e+00> : vector<64x256xf32>
    %42 = tpu.matmul %41, %32, %cst_17 {dimension_numbers = #tpu.dot_dimension_numbers<[1], [0], [0], [1], [0, 0, 1, 1], [], []>} : vector<64x12xf32>, vector<12x256xf32>, vector<64x256xf32> -> vector<64x256xf32>
    %43 = arith.addf %39, %42 : vector<64x256xf32>
    %c0_18 = arith.constant 0 : index
    %c0_19 = arith.constant 0 : index
    %44 = vector.load %arg4[%c0_18, %c0_19] : memref<64x2xf32, #tpu.memory_space<vmem>>, vector<64x1xf32>
    %45 = vector.broadcast %44 : vector<64x1xf32> to vector<64x256xf32>
    %46 = arith.addf %43, %45 : vector<64x256xf32>
    %cst_20 = arith.constant 0.000000e+00 : f32
    %47 = vector.broadcast %cst_20 : f32 to vector<64x256xf32>
    %48 = arith.cmpf oge, %46, %47 : vector<64x256xf32>
    %c0_21 = arith.constant 0 : index
    %c1_22 = arith.constant 1 : index
    %49 = vector.load %arg4[%c0_21, %c1_22] : memref<64x2xf32, #tpu.memory_space<vmem>>, vector<64x1xf32>
    %50 = vector.broadcast %49 : vector<64x1xf32> to vector<64x256xf32>
    %51 = arith.mulf %46, %50 : vector<64x256xf32>
    %52 = arith.select %48, %46, %51 : vector<64x256xi1>, vector<64x256xf32>
    %c0_23 = arith.constant 0 : index
    %c0_24 = arith.constant 0 : index
    %c0_25 = arith.constant 0 : index
    %53 = vector.load %arg5[%c0_23, %c0_24, %c0_25] : memref<1x64x256xf32, #tpu.memory_space<vmem>>, vector<1x64x256xf32>
    %54 = vector.shape_cast %53 : vector<1x64x256xf32> to vector<64x256xf32>
    %55 = vector.shape_cast %52 : vector<64x256xf32> to vector<1x64x256xf32>
    tpu.vector_store %arg5[%c0_23, %c0_24, %c0_25], %55 {strides = array<i32>} : memref<1x64x256xf32, #tpu.memory_space<vmem>>, vector<1x64x256xf32>,
    return
  }
  func.func @transform_0(%arg0: i32, %arg1: i32) -> (i32, i32, i32) {
    %c0_i32 = arith.constant 0 : i32
    %c0_i32_0 = arith.constant 0 : i32
    return %arg0, %c0_i32, %arg1 : i32, i32, i32
  }
  func.func @transform_1(%arg0: i32, %arg1: i32) -> (i32, i32, i32) {
    %c0_i32 = arith.constant 0 : i32
    %c0_i32_0 = arith.constant 0 : i32
    %c0_i32_1 = arith.constant 0 : i32
    %c0_i32_2 = arith.constant 0 : i32
    return %c0_i32, %c0_i32_0, %c0_i32_1 : i32, i32, i32
  }
  func.func @transform_2(%arg0: i32, %arg1: i32) -> (i32, i32) {
    %c0_i32 = arith.constant 0 : i32
    %c0_i32_0 = arith.constant 0 : i32
    %c0_i32_1 = arith.constant 0 : i32
    return %c0_i32, %c0_i32_0 : i32, i32
  }
  func.func @transform_3(%arg0: i32, %arg1: i32) -> (i32, i32, i32) {
    %c0_i32 = arith.constant 0 : i32
    %c0_i32_0 = arith.constant 0 : i32
    return %arg0, %c0_i32, %arg1 : i32, i32, i32
  }
}

</mosaic_0001>

<bundles_post_ra>
// kernel: upsample_forward.1
= control target key start
LH: loop header
LB: loop body
LE: loop exit
PB: predicated region body
PF: predicated region fallthrough
CT: control target
= control target key end

     0   :  { %s1091_s12 = smov 0   ;;  %s1093_s13 = smov 0   ;;  %s1402_s0 = inlined_call_operand.vmem [shape: f32[2,12,256], index: 0, kind: input, shape index: {}]   ;;  %s1403_s1 = inlined_call_operand.vmem [shape: f32[3,64,12], index: 1, kind: input, shape index: {}]   ;;  %s1404_s2 = inlined_call_operand.vmem [shape: f32[64,2], index: 2, kind: input, shape index: {}]   ;;  %s1405_s3 = inlined_call_operand.vmem [shape: f32[2,64,256], index: 3, kind: output, shape index: {}]  }
   0x1   :  { %s1095_s14 = smov 0  }
   0x2 LB: > { %s25_s15 = sadd.s32 1, %s1061_s13  ;;  %p918_p0 = scmp.ge.s32.totalorder %s1065_s14, 1  ;;  %s1065_s14 = sphi %s1095_s14, %s13_s14   ;;  %s1061_s13 = sphi %s1093_s13, %s1415_s13   ;;  %s1057_s12 = sphi %s1091_s12, %s1414_s12  }
   0x3   : > { %p27_p1 = scmp.ge.s32.totalorder %s25_s15, 2  ;;  %p158_p2 = scmp.lt.s32.totalorder %s1065_s14, 3 }
   0x5   : > { %s1417_s15 = smov (%p27_p1, %s25_s15), 0  ;;  %p159_p3 = pnand %p918_p0, %p158_p2 }
   0x6   : > { %p191_p4 = scmp.lt.s32.totalorder (!%p159_p3), %s1057_s12, 1  ;;  %s1067_s20 = smov (!%p159_p3), 1  }
   0x7   : > { %162 = sbr.rel (%p159_p3) target bundleno = 343 (0x157), region = 32  ;;  %s1068_s21 = smov (!%p159_p3), 127  }
   0xc   : > { %s1419_s12 = smov (!%p191_p4, %s1057_s12), 1  ;;  %vm329_vm0 = vcmask 1043456   ;;  %v927_v3 = vld [vmem:[%s1403_s1 + $0x60] sm:$0xff]  ;;  %vm304_vm1 = vcmask 97280   ;;  %v928_v6 = vld [vmem:[%s1403_s1 + $0x68] sm:$0xff]  ;;  %v929_v8 = vld [vmem:[%s1403_s1 + $0x70] sm:$0xff]  ;;  %v214_v11 = vlaneseq }
   0xd   : > { %s1003_s16 = sshll.u32 %s1419_s12, 5  ;;  %v923_v5 = vld [vmem:[%s1403_s1 + $0x40] sm:$0xff]  ;;  %v924_v7 = vld [vmem:[%s1403_s1 + $0x48] sm:$0xff]  ;;  %v925_v9 = vld [vmem:[%s1403_s1 + $0x50] sm:$0xff]  ;;  %v1069_v27 = vmov 0   ;;  %v1070_v39 = vmov 1  }
   0xe   : > { %s198_s19 = scalar_lea.vmem %s1402_s0, %s1003_s16  ;;  %v930_v10 = vld [vmem:[%s1403_s1 + $0x78] sm:$0xff]  ;;  %v1154_v12 = vand.u32 127, %v214_v11  ;;  %v668_v25 = vld [vmem:[%s1404_s2 + $0x8] sm:$0xff]  ;;  %v669_v26 = vld [vmem:[%s1404_s2 + $0x10] sm:$0xff]  ;;  %1039 = vset.pattern.permute.xlu1 %v1069_v27  ;;  %1038 = vset.pattern.permute.xlu0 %v1069_v27  ;;  %s1004_s17 = sshll.u32 %s1419_s12, 7 }
   0xf   : > { %v212_v0 = vld [vmem:[%s198_s19 + $0x10] sm:$0xf]  ;;  %v210_v1 = vld [vmem:[%s198_s19] sm:$0xff]  ;;  %v213_v2 = vld [vmem:[%s198_s19 + $0x18] sm:$0xf]  ;;  %1037 = vset.pattern.permute.xlu2 %v1069_v27 }
  0x10   : > { %245 = vrot.lane.b32.xlu0 %v212_v0, %s1067_s20  ;;  %243 = vrot.lane.b32.xlu1 %v210_v1, %s1067_s20  ;;  %v211_v4 = vld [vmem:[%s198_s19 + $0x8] sm:$0xff]  ;;  %v216_v13 = vadd.s32 128, %v1154_v12  ;;  %v221_v16 = vand.u32 15, %v1154_v12  ;;  %v926_v17 = vld [vmem:[%s1403_s1 + $0x58] sm:$0xff]  ;;  %vm274_vm2 = vcmp.lt.s32.totalorder %v1154_v12, 127  ;;  %vm251_vm5 = vcmp.lt.s32.totalorder %v1154_v12, 1 }
  0x11   : > { %268 = vrot.lane.b32.xlu2 %v212_v0, %s1068_s21  ;;  %1005 = vmatpush.msk.msra.mxu2 %vm329_vm0, %v212_v0  ;;  %v667_v28 = vld [vmem:[%s1404_s2] sm:$0xff]  ;;  %v673_v29 = vld [vmem:[%s1404_s2 + $0x30] sm:$0xff]  ;;  %v670_v33 = vld [vmem:[%s1404_s2 + $0x18] sm:$0xff] }
  0x12   : > { %1007 = vmatpush.msk.msra.mxu3 %vm329_vm0, %v213_v2  ;;  %931 = vmatpush.msk.msra.mxu0 %vm329_vm0, %v212_v0  ;;  %v228_v15 = vand.u32 15, %v216_v13  ;;  %vm1168_vm4 = vcmp.eq.s32.totalorder %v221_v16, 15  ;;  %v671_v30 = vld [vmem:[%s1404_s2 + $0x20] sm:$0xff]  ;;  %v674_v34 = vld [vmem:[%s1404_s2 + $0x38] sm:$0xff]  ;;  %vm1208_vm7 = vcmp.eq.s32.totalorder %v221_v16, 0  ;;  %v672_v47 = vld [vmem:[%s1404_s2 + $0x28] sm:$0xff] }
  0x13   : > { %1006 = vmatpush.msra.mxu2 %v210_v1  ;;  %940 = vmatpush.msk.msra.mxu1 %vm329_vm0, %v213_v2  ;;  %vm950_vm8 = vmneg %vm1208_vm7  ;;  %v287_v44 = vld [vmem:[%s1403_s1] sm:$0xff]  ;;  %v288_v53 = vld [vmem:[%s1403_s1 + $0x8] sm:$0xff] }
  0x14   : > { %1008 = vmatpush.msra.mxu3 %v211_v4  ;;  %936 = vmatmul.msk.f32.vlgmr.msra.gmra.mxu2 %vm304_vm1, %v927_v3  ;;  %vm1164_vm3 = vcmp.eq.s32.totalorder %v228_v15, 15  ;;  %vm1204_vm6 = vcmp.eq.s32.totalorder %v228_v15, 0  ;;  %vm980_vm10 = vmneg %vm1168_vm4  ;;  %v971_v50 = vld [vmem:[%s1403_s1 + $0x80] sm:$0xff]  ;;  %v972_v54 = vld [vmem:[%s1403_s1 + $0x88] sm:$0xff] }
  0x15   : > { %945 = vmatmul.msk.f32.vlgmr.msra.gmra.mxu3 %vm304_vm1, %v927_v3  ;;  %351 = vmatpush.msra.mxu0 %v210_v1  ;;  %vm961_vm9 = vmneg %vm1204_vm6  ;;  %v289_v55 = vld [vmem:[%s1403_s1 + $0x10] sm:$0xff]  ;;  %v290_v57 = vld [vmem:[%s1403_s1 + $0x18] sm:$0xff] }
  0x16   : > { %392 = vmatpush.msra.mxu1 %v211_v4  ;;  %932 = vmatmul.msk.f32.vlgmr.msra.gmra.mxu0 %vm304_vm1, %v923_v5  ;;  %vm991_vm11 = vmneg %vm1164_vm3  ;;  %v973_v56 = vld [vmem:[%s1403_s1 + $0x90] sm:$0xff]  ;;  %v974_v58 = vld [vmem:[%s1403_s1 + $0x98] sm:$0xff] }
  0x17   : > { %941 = vmatmul.msk.f32.vlgmr.msra.gmra.mxu1 %vm304_vm1, %v923_v5  ;;  %v291_v59 = vld [vmem:[%s1403_s1 + $0x20] sm:$0xff]  ;;  %v292_v61 = vld [vmem:[%s1403_s1 + $0x28] sm:$0xff]  ;;  %v293_v63 = vld [vmem:[%s1403_s1 + $0x30] sm:$0xff] }
  0x18   : > { %249 = vrot.lane.b32.xlu0 %v213_v2, %s1067_s20  ;;  %247 = vrot.lane.b32.xlu1 %v211_v4, %s1067_s20  ;;  %v975_v60 = vld [vmem:[%s1403_s1 + $0xa0] sm:$0xff]  ;;  %v976_v62 = vld [vmem:[%s1403_s1 + $0xa8] sm:$0xff]  ;;  %s1353_s20 = scalar_lea.vmem %s1405_s3, %s1004_s17 }
  0x19   : > { %272 = vrot.lane.b32.xlu2 %v213_v2, %s1068_s21  ;;  %v977_v0 = vld [vmem:[%s1403_s1 + $0xb0] sm:$0xff]  ;;  %v978_v2 = vld [vmem:[%s1403_s1 + $0xb8] sm:$0xff] }
  0x1c   : > { %937 = vmatmul.msk.f32.gmra.mxu2 %vm304_vm1, %v928_v6 }
  0x1d   : > { %946 = vmatmul.msk.f32.gmra.mxu3 %vm304_vm1, %v928_v6 }
  0x1e   : > { %933 = vmatmul.msk.f32.gmra.mxu0 %vm304_vm1, %v924_v7 }
  0x1f   : > { %942 = vmatmul.msk.f32.gmra.mxu1 %vm304_vm1, %v924_v7 }
  0x20   : > { %266 = vrot.lane.b32.xlu0 %v210_v1, %s1068_s21  ;;  %270 = vrot.lane.b32.xlu1 %v211_v4, %s1068_s21  ;;  %v294_v1 = vld [vmem:[%s1403_s1 + $0x38] sm:$0xff] }
  0x21   : > { %677 = vperm.xlu2 %1037, %v667_v28  }
  0x24   : > { %938 = vmatmul.msk.f32.gmra.mxu2 %vm304_vm1, %v929_v8 }
  0x25   : > { %947 = vmatmul.msk.f32.gmra.mxu3 %vm304_vm1, %v929_v8 }
  0x26   : > { %934 = vmatmul.msk.f32.gmra.mxu0 %vm304_vm1, %v925_v9 }
  0x27   : > { %943 = vmatmul.msk.f32.gmra.mxu1 %vm304_vm1, %v925_v9 }
  0x28   : > { %682 = vperm.xlu0 %1038, %v668_v25   ;;  %687 = vperm.xlu1 %1039, %v669_v26  }
  0x29   : > { %692 = vperm.xlu2 %1037, %v670_v33  }
  0x2c   : > { %939 = vmatmul.msk.f32.gmra.mxu2 %vm304_vm1, %v930_v10 }
  0x2d   : > { %948 = vmatmul.msk.f32.gmra.mxu3 %vm304_vm1, %v930_v10 }
  0x2e   : > { %935 = vmatmul.msk.f32.gmra.mxu0 %vm304_vm1, %v926_v17 }
  0x2f   : > { %944 = vmatmul.msk.f32.gmra.mxu1 %vm304_vm1, %v926_v17 }
  0x30   : > { %707 = vperm.xlu0 %1038, %v673_v29   ;;  %697 = vperm.xlu1 %1039, %v671_v30  }
  0x31   : > { %702 = vperm.xlu2 %1037, %v672_v47  }
  0x38   : > { %1041 = vset.pattern.permute.xlu0 %v1070_v39  ;;  %712 = vperm.xlu1 %1039, %v674_v34  }
  0x39   : > { %752 = vperm.xlu0 %1041, %v668_v25   ;;  %1040 = vset.pattern.permute.xlu2 %v1070_v39 }
  0x3a   : > { %748 = vperm.xlu2 %1040, %v667_v28  }
  0x40   : > { %1042 = vset.pattern.permute.xlu1 %v1070_v39 }
  0x41   : > { %756 = vperm.xlu1 %1042, %v669_v26   ;;  %772 = vperm.xlu0 %1041, %v673_v29  }
  0x42   : > { %760 = vperm.xlu2 %1040, %v670_v33  }
  0x49   : > { %764 = vperm.xlu1 %1042, %v671_v30  }
  0x4a   : > { %768 = vperm.xlu2 %1040, %v672_v47  }
  0x51   : > { %776 = vperm.xlu1 %1042, %v674_v34  }
  0x6b   : > { %v269_v14 = vpop.permute.xlu2 %268 }
  0x73   : > { %v273_v20 = vpop.permute.xlu2 %272 }
  0x74   : > { %v276_v21 = vsel %vm274_vm2, %v269_v14, %v273_v20  ;;  %v278_v22 = vsel %vm274_vm2, %v273_v20, %v269_v14 }
  0x75   : > { %v286_v23 = vsel %vm1164_vm3, 0.0, %v278_v22  ;;  %v285_v24 = vsel %vm1168_vm4, 0.0, %v276_v21 }
  0x76   : > { %990 = vmatpush.msk.msrb.mxu1 %vm329_vm0, %v286_v23  ;;  %979 = vmatpush.msk.msrb.mxu0 %vm329_vm0, %v285_v24 }
  0x7b   : > { %v678_v11 = vpop.permute.xlu2 %677 }
  0x82   : > { %v246_v31 = vpop.permute.xlu0 %245  ;;  %v244_v32 = vpop.permute.xlu1 %243 }
  0x83   : > { %v1333_v16 = vpop.permute.xlu2 %692 }
  0x8a   : > { %v250_v37 = vpop.permute.xlu0 %249  ;;  %v248_v38 = vpop.permute.xlu1 %247 }
  0x8b   : > { %v253_v40 = vsel %vm251_vm5, %v246_v31, %v250_v37  ;;  %v255_v41 = vsel %vm251_vm5, %v250_v37, %v246_v31  ;;  %v254_v45 = vsel %vm251_vm5, %v248_v38, %v244_v32  ;;  %v252_v46 = vsel %vm251_vm5, %v244_v32, %v248_v38  ;;  %v1343_v23 = vpop.permute.xlu2 %702 }
  0x8c   : > { %v263_v42 = vsel %vm1204_vm6, 0.0, %v253_v40  ;;  %v262_v43 = vsel %vm1208_vm7, 0.0, %v255_v41 }
  0x8d   : > { %960 = vmatpush.msk.msrb.mxu3 %vm329_vm0, %v263_v42  ;;  %949 = vmatpush.msk.msrb.mxu2 %vm329_vm0, %v262_v43 }
  0x8f   : > { %951 = vmatpush.msk.msrb.mxu2 %vm950_vm8, %v254_v45  ;;  %962 = vmatpush.msk.msrb.mxu3 %vm961_vm9, %v252_v46 }
  0x90   : > { %952 = vmatmul.msk.f32.vlgmr.msrb.gmra.mxu2 %vm304_vm1, %v287_v44  ;;  %963 = vmatmul.msk.f32.vlgmr.msrb.gmra.mxu3 %vm304_vm1, %v287_v44 }
  0x92   : > { %v267_v48 = vpop.permute.xlu0 %266  ;;  %v271_v49 = vpop.permute.xlu1 %270 }
  0x93   : > { %v275_v51 = vsel %vm274_vm2, %v267_v48, %v271_v49  ;;  %v277_v52 = vsel %vm274_vm2, %v271_v49, %v267_v48  ;;  %v353_v3 = vpop.f32.mrf.mxu0 }
  0x94   : > { %981 = vmatpush.msk.msrb.mxu0 %vm980_vm10, %v275_v51  ;;  %992 = vmatpush.msk.msrb.mxu1 %vm991_vm11, %v277_v52  ;;  %v394_v4 = vpop.f32.mrf.mxu1  ;;  %v749_v34 = vpop.permute.xlu2 %748 }
  0x95   : > { %982 = vmatmul.msk.f32.vlgmr.msrb.gmra.mxu0 %vm304_vm1, %v971_v50  ;;  %993 = vmatmul.msk.f32.vlgmr.msrb.gmra.mxu1 %vm304_vm1, %v971_v50 }
  0x97   : > { %v1321_v5 = vpop.f32.mrf.mxu2 }
  0x98   : > { %953 = vmatmul.msk.f32.gmra.mxu2 %vm304_vm1, %v288_v53  ;;  %964 = vmatmul.msk.f32.gmra.mxu3 %vm304_vm1, %v288_v53  ;;  %v1323_v6 = vpop.f32.mrf.mxu3 }
  0x9a   : > { %v688_v17 = vpop.permute.xlu1 %687  ;;  %v683_v22 = vpop.permute.xlu0 %682 }
  0x9b   : > { %v356_v7 = vpop.f32.mrf.mxu0 }
  0x9c   : > { %v397_v8 = vpop.f32.mrf.mxu1 }
  0x9d   : > { %983 = vmatmul.msk.f32.gmra.mxu0 %vm304_vm1, %v972_v54  ;;  %994 = vmatmul.msk.f32.gmra.mxu1 %vm304_vm1, %v972_v54 }
  0x9f   : > { %v1325_v9 = vpop.f32.mrf.mxu2 }
  0xa0   : > { %954 = vmatmul.msk.f32.gmra.mxu2 %vm304_vm1, %v289_v55  ;;  %965 = vmatmul.msk.f32.gmra.mxu3 %vm304_vm1, %v289_v55  ;;  %v1327_v10 = vpop.f32.mrf.mxu3 }
  0xa2   : > { %v1345_v24 = vpop.permute.xlu1 %697  ;;  %v1347_v31 = vpop.permute.xlu0 %707 }
  0xa3   : > { %v359_v12 = vpop.f32.mrf.mxu0 }
  0xa4   : > { %v400_v13 = vpop.f32.mrf.mxu1 }
  0xa5   : > { %984 = vmatmul.msk.f32.gmra.mxu0 %vm304_vm1, %v973_v56  ;;  %995 = vmatmul.msk.f32.gmra.mxu1 %vm304_vm1, %v973_v56 }
  0xa7   : > { %v1329_v14 = vpop.f32.mrf.mxu2 }
  0xa8   : > { %955 = vmatmul.msk.f32.gmra.mxu2 %vm304_vm1, %v290_v57  ;;  %966 = vmatmul.msk.f32.gmra.mxu3 %vm304_vm1, %v290_v57  ;;  %v1331_v15 = vpop.f32.mrf.mxu3 }
  0xaa   : > { %v1356_v47 = vpop.permute.xlu1 %712 }
  0xab   : > { %v1335_v18 = vpop.f32.mrf.mxu0  ;;  %v753_v50 = vpop.permute.xlu0 %752 }
  0xac   : > { %v1337_v19 = vpop.f32.mrf.mxu1 }
  0xad   : > { %985 = vmatmul.msk.f32.gmra.mxu0 %vm304_vm1, %v974_v58  ;;  %996 = vmatmul.msk.f32.gmra.mxu1 %vm304_vm1, %v974_v58 }
  0xaf   : > { %v1339_v20 = vpop.f32.mrf.mxu2 }
  0xb0   : > { %956 = vmatmul.msk.f32.gmra.mxu2 %vm304_vm1, %v291_v59  ;;  %967 = vmatmul.msk.f32.gmra.mxu3 %vm304_vm1, %v291_v59  ;;  %v1341_v21 = vpop.f32.mrf.mxu3 }
  0xb5   : > { %986 = vmatmul.msk.f32.gmra.mxu0 %vm304_vm1, %v975_v60  ;;  %997 = vmatmul.msk.f32.gmra.mxu1 %vm304_vm1, %v975_v60 }
  0xb8   : > { %957 = vmatmul.msk.f32.gmra.mxu2 %vm304_vm1, %v292_v61  ;;  %968 = vmatmul.msk.f32.gmra.mxu3 %vm304_vm1, %v292_v61 }
  0xbd   : > { %987 = vmatmul.msk.f32.gmra.mxu0 %vm304_vm1, %v976_v62  ;;  %998 = vmatmul.msk.f32.gmra.mxu1 %vm304_vm1, %v976_v62 }
  0xc0   : > { %958 = vmatmul.msk.f32.gmra.mxu2 %vm304_vm1, %v293_v63  ;;  %969 = vmatmul.msk.f32.gmra.mxu3 %vm304_vm1, %v293_v63 }
  0xc5   : > { %988 = vmatmul.msk.f32.gmra.mxu0 %vm304_vm1, %v977_v0  ;;  %999 = vmatmul.msk.f32.gmra.mxu1 %vm304_vm1, %v977_v0 }
  0xc8   : > { %959 = vmatmul.msk.f32.gmra.mxu2 %vm304_vm1, %v294_v1  ;;  %970 = vmatmul.msk.f32.gmra.mxu3 %vm304_vm1, %v294_v1  ;;  %v757_v1 = vpop.permute.xlu1 %756 }
  0xcd   : > { %989 = vmatmul.msk.f32.gmra.mxu0 %vm304_vm1, %v978_v2  ;;  %1000 = vmatmul.msk.f32.gmra.mxu1 %vm304_vm1, %v978_v2 }
 0x112   : > { %v586_v25 = vpop.f32.mrf.mxu0  ;;  %v627_v26 = vpop.f32.mrf.mxu1 }
 0x113   : > { %v465_v27 = vpop.f32.mrf.mxu2  ;;  %v506_v28 = vpop.f32.mrf.mxu3 }
 0x114   : > { %v466_v29 = vadd.f32 %v465_v27, %v353_v3  ;;  %v507_v30 = vadd.f32 %v506_v28, %v394_v4 }
 0x116   : > { %v651_v32 = vadd.f32 %v586_v25, %v466_v29  ;;  %v652_v33 = vadd.f32 %v627_v26, %v507_v30 }
 0x118   : > { %v715_v35 = vadd.f32 %v678_v11, %v651_v32  ;;  %v716_v36 = vadd.f32 %v678_v11, %v652_v33 }
 0x11a   : > { %vm731_vm12 = vcmp.ge.f32.partialorder %v715_v35, 0.0  ;;  %vm732_vm13 = vcmp.ge.f32.partialorder %v716_v36, 0.0  ;;  %v779_v37 = vmul.f32 %v749_v34, %v715_v35  ;;  %v780_v38 = vmul.f32 %v749_v34, %v716_v36  ;;  %v589_v39 = vpop.f32.mrf.mxu0  ;;  %v630_v40 = vpop.f32.mrf.mxu1 }
 0x11b   : > { %v468_v41 = vpop.f32.mrf.mxu2  ;;  %v509_v42 = vpop.f32.mrf.mxu3 }
 0x11c   : > { %v795_v43 = vsel %vm731_vm12, %v715_v35, %v779_v37  ;;  %v796_v44 = vsel %vm732_vm13, %v716_v36, %v780_v38  ;;  %v469_v45 = vadd.f32 %v468_v41, %v356_v7  ;;  %v510_v46 = vadd.f32 %v509_v42, %v397_v8 }
 0x11d   : > { %811 = vst [vmem:[%s1353_s20] sm:$0xff] %v795_v43 }
 0x11e   : > { %812 = vst [vmem:[%s1353_s20 + $0x8] sm:$0xff] %v796_v44  ;;  %v653_v48 = vadd.f32 %v589_v39, %v469_v45  ;;  %v654_v49 = vadd.f32 %v630_v40, %v510_v46 }
 0x120   : > { %v717_v51 = vadd.f32 %v683_v22, %v653_v48  ;;  %v718_v52 = vadd.f32 %v683_v22, %v654_v49 }
 0x122   : > { %vm733_vm14 = vcmp.ge.f32.partialorder %v717_v51, 0.0  ;;  %vm734_vm15 = vcmp.ge.f32.partialorder %v718_v52, 0.0  ;;  %v781_v53 = vmul.f32 %v753_v50, %v717_v51  ;;  %v782_v54 = vmul.f32 %v753_v50, %v718_v52  ;;  %v592_v55 = vpop.f32.mrf.mxu0  ;;  %v633_v56 = vpop.f32.mrf.mxu1 }
 0x123   : > { %v471_v57 = vpop.f32.mrf.mxu2  ;;  %v512_v58 = vpop.f32.mrf.mxu3 }
 0x124   : > { %v797_v59 = vsel %vm733_vm14, %v717_v51, %v781_v53  ;;  %v798_v60 = vsel %vm734_vm15, %v718_v52, %v782_v54  ;;  %v472_v61 = vadd.f32 %v471_v57, %v359_v12  ;;  %v513_v62 = vadd.f32 %v512_v58, %v400_v13 }
 0x125   : > { %813 = vst [vmem:[%s1353_s20 + $0x10] sm:$0xff] %v797_v59 }
 0x126   : > { %814 = vst [vmem:[%s1353_s20 + $0x18] sm:$0xff] %v798_v60  ;;  %v655_v63 = vadd.f32 %v592_v55, %v472_v61  ;;  %v656_v0 = vadd.f32 %v633_v56, %v513_v62 }
 0x128   : > { %v719_v2 = vadd.f32 %v688_v17, %v655_v63  ;;  %v720_v3 = vadd.f32 %v688_v17, %v656_v0  ;;  %v761_v17 = vpop.permute.xlu2 %760 }
 0x12a   : > { %vm735_vm0 = vcmp.ge.f32.partialorder %v719_v2, 0.0  ;;  %vm736_vm1 = vcmp.ge.f32.partialorder %v720_v3, 0.0  ;;  %v783_v4 = vmul.f32 %v757_v1, %v719_v2  ;;  %v784_v7 = vmul.f32 %v757_v1, %v720_v3  ;;  %v595_v8 = vpop.f32.mrf.mxu0  ;;  %v636_v11 = vpop.f32.mrf.mxu1 }
 0x12b   : > { %v474_v22 = vpop.f32.mrf.mxu2  ;;  %v515_v25 = vpop.f32.mrf.mxu3 }
 0x12c   : > { %v799_v26 = vsel %vm735_vm0, %v719_v2, %v783_v4  ;;  %v800_v12 = vsel %vm736_vm1, %v720_v3, %v784_v7  ;;  %v475_v13 = vadd.f32 %v474_v22, %v1335_v18  ;;  %v516_v27 = vadd.f32 %v515_v25, %v1337_v19 }
 0x12d   : > { %815 = vst [vmem:[%s1353_s20 + $0x20] sm:$0xff] %v799_v26 }
 0x12e   : > { %816 = vst [vmem:[%s1353_s20 + $0x28] sm:$0xff] %v800_v12  ;;  %v657_v28 = vadd.f32 %v595_v8, %v475_v13  ;;  %v658_v29 = vadd.f32 %v636_v11, %v516_v27 }
 0x130   : > { %v721_v30 = vadd.f32 %v1333_v16, %v657_v28  ;;  %v722_v32 = vadd.f32 %v1333_v16, %v658_v29  ;;  %v765_v16 = vpop.permute.xlu1 %764 }
 0x132   : > { %vm737_vm2 = vcmp.ge.f32.partialorder %v721_v30, 0.0  ;;  %vm738_vm3 = vcmp.ge.f32.partialorder %v722_v32, 0.0  ;;  %v785_v33 = vmul.f32 %v761_v17, %v721_v30  ;;  %v786_v34 = vmul.f32 %v761_v17, %v722_v32  ;;  %v598_v35 = vpop.f32.mrf.mxu0  ;;  %v639_v36 = vpop.f32.mrf.mxu1 }
 0x133   : > { %v477_v18 = vpop.f32.mrf.mxu2  ;;  %v518_v37 = vpop.f32.mrf.mxu3 }
 0x134   : > { %v801_v19 = vsel %vm737_vm2, %v721_v30, %v785_v33  ;;  %v802_v38 = vsel %vm738_vm3, %v722_v32, %v786_v34  ;;  %v478_v39 = vadd.f32 %v477_v18, %v1321_v5  ;;  %v519_v40 = vadd.f32 %v518_v37, %v1323_v6 }
 0x135   : > { %817 = vst [vmem:[%s1353_s20 + $0x30] sm:$0xff] %v801_v19 }
 0x136   : > { %818 = vst [vmem:[%s1353_s20 + $0x38] sm:$0xff] %v802_v38  ;;  %v659_v41 = vadd.f32 %v598_v35, %v478_v39  ;;  %v660_v42 = vadd.f32 %v639_v36, %v519_v40 }
 0x138   : > { %v723_v43 = vadd.f32 %v1345_v24, %v659_v41  ;;  %v724_v44 = vadd.f32 %v1345_v24, %v660_v42  ;;  %v769_v24 = vpop.permute.xlu2 %768  ;;  %v777_v30 = vpop.permute.xlu1 %776 }
 0x13a   : > { %vm739_vm4 = vcmp.ge.f32.partialorder %v723_v43, 0.0  ;;  %vm740_vm5 = vcmp.ge.f32.partialorder %v724_v44, 0.0  ;;  %v787_v45 = vmul.f32 %v765_v16, %v723_v43  ;;  %v788_v46 = vmul.f32 %v765_v16, %v724_v44  ;;  %v601_v48 = vpop.f32.mrf.mxu0  ;;  %v642_v49 = vpop.f32.mrf.mxu1 }
 0x13b   : > { %v480_v5 = vpop.f32.mrf.mxu2  ;;  %v521_v50 = vpop.f32.mrf.mxu3 }
 0x13c   : > { %v803_v6 = vsel %vm739_vm4, %v723_v43, %v787_v45  ;;  %v804_v51 = vsel %vm740_vm5, %v724_v44, %v788_v46  ;;  %v481_v52 = vadd.f32 %v480_v5, %v1325_v9  ;;  %v522_v53 = vadd.f32 %v521_v50, %v1327_v10 }
 0x13d   : > { %819 = vst [vmem:[%s1353_s20 + $0x40] sm:$0xff] %v803_v6 }
 0x13e   : > { %820 = vst [vmem:[%s1353_s20 + $0x48] sm:$0xff] %v804_v51  ;;  %v661_v54 = vadd.f32 %v601_v48, %v481_v52  ;;  %v662_v55 = vadd.f32 %v642_v49, %v522_v53 }
 0x140   : > { %v725_v56 = vadd.f32 %v1343_v23, %v661_v54  ;;  %v726_v57 = vadd.f32 %v1343_v23, %v662_v55  ;;  %v773_v23 = vpop.permute.xlu0 %772 }
 0x142   : > { %vm741_vm6 = vcmp.ge.f32.partialorder %v725_v56, 0.0  ;;  %vm742_vm7 = vcmp.ge.f32.partialorder %v726_v57, 0.0  ;;  %v789_v58 = vmul.f32 %v769_v24, %v725_v56  ;;  %v790_v59 = vmul.f32 %v769_v24, %v726_v57  ;;  %v604_v60 = vpop.f32.mrf.mxu0  ;;  %v645_v61 = vpop.f32.mrf.mxu1 }
 0x143   : > { %v483_v9 = vpop.f32.mrf.mxu2  ;;  %v524_v62 = vpop.f32.mrf.mxu3 }
 0x144   : > { %v805_v10 = vsel %vm741_vm6, %v725_v56, %v789_v58  ;;  %v806_v63 = vsel %vm742_vm7, %v726_v57, %v790_v59  ;;  %v484_v0 = vadd.f32 %v483_v9, %v1329_v14  ;;  %v525_v1 = vadd.f32 %v524_v62, %v1331_v15 }
 0x145   : > { %821 = vst [vmem:[%s1353_s20 + $0x50] sm:$0xff] %v805_v10 }
 0x146   : > { %822 = vst [vmem:[%s1353_s20 + $0x58] sm:$0xff] %v806_v63  ;;  %v663_v2 = vadd.f32 %v604_v60, %v484_v0  ;;  %v664_v3 = vadd.f32 %v645_v61, %v525_v1 }
 0x148   : > { %v727_v4 = vadd.f32 %v1347_v31, %v663_v2  ;;  %v728_v7 = vadd.f32 %v1347_v31, %v664_v3 }
 0x14a   : > { %vm743_vm8 = vcmp.ge.f32.partialorder %v727_v4, 0.0  ;;  %vm744_vm9 = vcmp.ge.f32.partialorder %v728_v7, 0.0  ;;  %v791_v8 = vmul.f32 %v773_v23, %v727_v4  ;;  %v792_v11 = vmul.f32 %v773_v23, %v728_v7  ;;  %v607_v22 = vpop.f32.mrf.mxu0  ;;  %v648_v25 = vpop.f32.mrf.mxu1 }
 0x14b   : > { %v486_v14 = vpop.f32.mrf.mxu2  ;;  %v527_v26 = vpop.f32.mrf.mxu3 }
 0x14c   : > { %v807_v15 = vsel %vm743_vm8, %v727_v4, %v791_v8  ;;  %v808_v12 = vsel %vm744_vm9, %v728_v7, %v792_v11  ;;  %v487_v13 = vadd.f32 %v486_v14, %v1339_v20  ;;  %v528_v27 = vadd.f32 %v527_v26, %v1341_v21 }
 0x14d   : > { %823 = vst [vmem:[%s1353_s20 + $0x60] sm:$0xff] %v807_v15 }
 0x14e   : > { %824 = vst [vmem:[%s1353_s20 + $0x68] sm:$0xff] %v808_v12  ;;  %v665_v28 = vadd.f32 %v607_v22, %v487_v13  ;;  %v666_v31 = vadd.f32 %v648_v25, %v528_v27 }
 0x150   : > { %v729_v29 = vadd.f32 %v1356_v47, %v665_v28  ;;  %v730_v17 = vadd.f32 %v1356_v47, %v666_v31 }
 0x152   : > { %vm745_vm10 = vcmp.ge.f32.partialorder %v729_v29, 0.0  ;;  %vm746_vm11 = vcmp.ge.f32.partialorder %v730_v17, 0.0  ;;  %v793_v32 = vmul.f32 %v777_v30, %v729_v29  ;;  %v794_v33 = vmul.f32 %v777_v30, %v730_v17 }
 0x154   : > { %v809_v34 = vsel %vm745_vm10, %v729_v29, %v793_v32  ;;  %v810_v35 = vsel %vm746_vm11, %v730_v17, %v794_v33 }
 0x155   : > { %825 = vst [vmem:[%s1353_s20 + $0x70] sm:$0xff] %v809_v34 }
 0x156   : > { %826 = vst [vmem:[%s1353_s20 + $0x78] sm:$0xff] %v810_v35 }
 0x157 PF: > { %s13_s14 = sadd.s32 1, %s1065_s14   ;;  %s1414_s12 = smov %s1061_s13 }
 0x158   : > { %p10_p5 = scmp.ge.s32.totalorder %s13_s14, 4   ;;  %s1415_s13 = smov %s1417_s15 }
 0x15a   :  { %12 = sbr.rel (!%p10_p5) target bundleno = 2 (0x2), region = 64 }

</bundles_post_ra>
